<compile_context>
chip_gen: v7x
topology: tpu7x:2x2x1
jax: 0.10.0
libtpu: 0.0.40
codegen_flags: <defaults>
</compile_context>

<pallas_src>
import jax
import jax.numpy as jnp
from jax import lax
from jax.experimental import pallas as pl
from jax.experimental.pallas import tpu as pltpu


def _bilstm_kernel(maxlen_ref,                 # (1,) int32, SMEM (scalar prefetch)
                   gxf_ref, gxb_ref,           # (T, Bc, 4H) f32: hoisted x-gates
                   len_ref,                    # (Bc, 1) int32 lengths
                   whh_f_ref, whh_b_ref,       # (H, 4H) bf16 recurrent weights
                   h0_ref, c0_ref,             # (2, Bc, H) f32 initial states
                   y_ref,                      # (T, Bc, H) f32 output (fwd+bwd)
                   ybwd_ref):                  # (T, Bc, H) f32 scratch (bwd acc)
    T, Bc, G = gxf_ref.shape
    H = y_ref.shape[-1]

    max_len = maxlen_ref[0]
    lengths = len_ref[...]                     # (Bc, 1) int32
    whh_f = whh_f_ref[...]                     # (H, 4H) bf16
    whh_b = whh_b_ref[...]

    # Output / backward accumulator start at zero (timesteps >= length or
    # >= max_len are never written and must stay zero).
    y_ref[...] = jnp.zeros_like(y_ref)
    ybwd_ref[...] = jnp.zeros_like(ybwd_ref)

    def lstm_cell(pre, c):
        # pre: (Bc, 4H) f32 pre-activations, PyTorch gate order i, f, g, o.
        i_g = jax.nn.sigmoid(pre[:, 0 * H:1 * H])
        f_g = jax.nn.sigmoid(pre[:, 1 * H:2 * H])
        g_g = jnp.tanh(pre[:, 2 * H:3 * H])
        o_g = jax.nn.sigmoid(pre[:, 3 * H:4 * H])
        c_new = f_g * c + i_g * g_g
        h_new = o_g * jnp.tanh(c_new)
        return h_new, c_new

    def step(i, carry):
        h_f, c_f, h_b, c_b = carry
        t_f = i
        t_b = max_len - 1 - i

        # ---- forward direction at t_f --------------------------------------
        pre_f = gxf_ref[t_f] + jnp.dot(h_f.astype(jnp.bfloat16), whh_f,
                                       preferred_element_type=jnp.float32)
        h_f_new, c_f_new = lstm_cell(pre_f, c_f)
        valid_f = lengths > t_f                                  # (Bc, 1)
        h_f = jnp.where(valid_f, h_f_new, h_f)
        c_f = jnp.where(valid_f, c_f_new, c_f)
        y_ref[t_f] = jnp.where(valid_f, h_f_new, 0.0).astype(y_ref.dtype)

        # ---- backward direction at t_b (independent matmul chain) ----------
        pre_b = gxb_ref[t_b] + jnp.dot(h_b.astype(jnp.bfloat16), whh_b,
                                       preferred_element_type=jnp.float32)
        h_b_new, c_b_new = lstm_cell(pre_b, c_b)
        valid_b = lengths > t_b
        h_b = jnp.where(valid_b, h_b_new, h_b)
        c_b = jnp.where(valid_b, c_b_new, c_b)
        ybwd_ref[t_b] = jnp.where(valid_b, h_b_new, 0.0).astype(ybwd_ref.dtype)

        return h_f, c_f, h_b, c_b

    init = (h0_ref[0], c0_ref[0], h0_ref[1], c0_ref[1])
    lax.fori_loop(0, max_len, step, init)

    # Sum the two directions (matches .unflatten(-1, (2, -1)).sum(-2)).
    y_ref[...] = y_ref[...] + ybwd_ref[...]


def bilstm_pallas(x, lengths, lstm_params, h0, c0, *, batch_shards=1):
    """x: (B, T, H) float32 batch-first (PyTorch convention); lengths: (B,).
    Returns (B, T, H) = forward + backward hidden states, zero-padded past
    each sequence's length (identical to pad_packed_sequence output values)."""
    B, T, H = x.shape
    G = 4 * H
    f32, bf16 = jnp.float32, jnp.bfloat16

    # --- hoisted input projection (one big matmul, bf16 in / f32 acc) -------
    w_x = jnp.concatenate([lstm_params["w_ih_f"].T,
                           lstm_params["w_ih_b"].T], axis=1).astype(bf16)   # (H, 8H)
    b_x = jnp.concatenate([lstm_params["b_ih_f"] + lstm_params["b_hh_f"],
                           lstm_params["b_ih_b"] + lstm_params["b_hh_b"]]
                          ).astype(f32)                                     # (8H,)

    x_tm = jnp.transpose(x, (1, 0, 2)).astype(bf16)                         # (T, B, H)
    gx = jnp.dot(x_tm, w_x, preferred_element_type=f32) + b_x               # (T, B, 8H)
    gx_f = gx[..., :G]                                                      # (T, B, 4H)
    gx_b = gx[..., G:]

    whh_f = lstm_params["w_hh_f"].T.astype(bf16)                            # (H, 4H)
    whh_b = lstm_params["w_hh_b"].T.astype(bf16)

    len2 = lengths.astype(jnp.int32).reshape(B, 1)
    max_len = jnp.max(lengths).astype(jnp.int32).reshape(1)                 # SMEM scalar

    h0_full = jnp.broadcast_to(h0, (2, B, H)).astype(f32)
    c0_full = jnp.broadcast_to(c0, (2, B, H)).astype(f32)

    # --- optional batch grid (lets v7x split the batch across its 2 TCs) ----
    shards = batch_shards if (batch_shards > 1 and B % batch_shards == 0
                              and (B // batch_shards) % 8 == 0) else 1
    Bc = B // shards

    # --- VMEM budget (resident set + pipelining margin) ---------------------
    est = 4 * T * Bc * (2 * G + 2 * H)       # gx_f, gx_b, y, ybwd (f32)
    est += 2 * 2 * H * G                     # two bf16 W_hh
    est += 4 * 2 * 2 * Bc * H                # h0, c0
    vmem_limit = int(min(64 << 20, max(32 << 20, 4 * est)))

    grid_spec = pltpu.PrefetchScalarGridSpec(
        num_scalar_prefetch=1,
        grid=(shards,),
        in_specs=[
            pl.BlockSpec((T, Bc, G), lambda b, ml: (0, b, 0)),   # gx_f
            pl.BlockSpec((T, Bc, G), lambda b, ml: (0, b, 0)),   # gx_b
            pl.BlockSpec((Bc, 1), lambda b, ml: (b, 0)),         # lengths
            pl.BlockSpec((H, G), lambda b, ml: (0, 0)),          # whh_f
            pl.BlockSpec((H, G), lambda b, ml: (0, 0)),          # whh_b
            pl.BlockSpec((2, Bc, H), lambda b, ml: (0, b, 0)),   # h0
            pl.BlockSpec((2, Bc, H), lambda b, ml: (0, b, 0)),   # c0
        ],
        out_specs=pl.BlockSpec((T, Bc, H), lambda b, ml: (0, b, 0)),
        scratch_shapes=[pltpu.VMEM((T, Bc, H), jnp.float32)],    # bwd accumulator
    )

    y_tm = pl.pallas_call(
        _bilstm_kernel,
        out_shape=jax.ShapeDtypeStruct((T, B, H), jnp.float32),
        grid_spec=grid_spec,
        compiler_params=pltpu.CompilerParams(
            dimension_semantics=("parallel",),
            vmem_limit_bytes=vmem_limit),
    )(max_len, gx_f, gx_b, len2, whh_f, whh_b, h0_full, c0_full)

    return jnp.transpose(y_tm, (1, 0, 2))                        # (B, T, H)


def bilstm_layer_forward(out_p, out_h, length_h, length_p, params):
    """Equivalent of BiLSTMLayer.forward: returns (out_p, out_h)."""
    y_h = bilstm_pallas(out_h, length_h, params["lstm"],
                        params["h_0h"], params["c_0h"])
    y_p = bilstm_pallas(out_p, length_p, params["lstm"],
                        params["h_0p"], params["c_0p"])
    return y_p, y_h


def init_params(key, hidden_size):
    """Parameter init mirroring nn.LSTM defaults (uniform(-1/sqrt(H), 1/sqrt(H)));
    h0/c0 parameters are zeros as in BiLSTMLayer.__init__."""
    H = hidden_size
    k = 1.0 / jnp.sqrt(jnp.float32(H))
    names = ["w_ih_f", "w_hh_f", "b_ih_f", "b_hh_f",
             "w_ih_b", "w_hh_b", "b_ih_b", "b_hh_b"]
    shapes = [(4 * H, H), (4 * H, H), (4 * H,), (4 * H,),
              (4 * H, H), (4 * H, H), (4 * H,), (4 * H,)]
    keys = jax.random.split(key, len(names))
    lstm = {n: jax.random.uniform(kk, s, jnp.float32, -k, k)
            for n, s, kk in zip(names, shapes, keys)}
    zeros = jnp.zeros((2, 1, H), jnp.float32)
    return {"lstm": lstm, "h_0h": zeros, "c_0h": zeros,
            "h_0p": zeros, "c_0p": zeros}


if __name__ == "__main__":
    B, T, H = 2, 8, 32
    key = jax.random.PRNGKey(0)
    k_p, k_h, k_w = jax.random.split(key, 3)

    out_p = jax.random.normal(k_p, (B, T, H), jnp.float32)
    out_h = jax.random.normal(k_h, (B, T, H), jnp.float32)
    length_h = jnp.array([T, 5], jnp.int32)
    length_p = jnp.array([T, 6], jnp.int32)

    params = init_params(k_w, H)

    fwd = jax.jit(bilstm_layer_forward)          # wrapper is jit-safe (no host sync)
    y_p, y_h = fwd(out_p, out_h, length_h, length_p, params)
    jax.block_until_ready((y_p, y_h))

    assert y_p.shape == (B, T, H) and y_h.shape == (B, T, H)
    # padded positions must be exactly zero (pad_packed_sequence semantics)
    assert float(jnp.abs(y_h[1, 5:, :]).max()) == 0.0
    assert float(jnp.abs(y_p[1, 6:, :]).max()) == 0.0
    print("KERNEL_OK")
</pallas_src>

<mosaic_0001>
module attributes {stable_mosaic.version = 11 : i64} {
  func.func @_bilstm_kernel(%arg0: i32, %arg1: memref<1xi32, #tpu.memory_space<smem>>, %arg2: memref<8x2x128xf32, #tpu.memory_space<vmem>>, %arg3: memref<8x2x128xf32, #tpu.memory_space<vmem>>, %arg4: memref<2x1xi32, #tpu.memory_space<vmem>>, %arg5: memref<32x128xbf16, #tpu.memory_space<vmem>>, %arg6: memref<32x128xbf16, #tpu.memory_space<vmem>>, %arg7: memref<2x2x32xf32, #tpu.memory_space<vmem>>, %arg8: memref<2x2x32xf32, #tpu.memory_space<vmem>>, %arg9: memref<8x2x32xf32, #tpu.memory_space<vmem>>, %arg10: memref<8x2x32xf32, #tpu.memory_space<vmem>>) attributes {dimension_semantics = [#tpu.dimension_semantics<parallel>], iteration_bounds = array<i64: 1>, scalar_prefetch = 1 : i64, scratch_operands = 1 : i64, tpu.core_type = #tpu.core_type<tc>, window_params = [{transform_indices = @transform_0, window_bounds = array<i64: 8, 2, 128>}, {transform_indices = @transform_1, window_bounds = array<i64: 8, 2, 128>}, {transform_indices = @transform_2, window_bounds = array<i64: 2, 1>}, {pipeline_mode = #tpu.pipeline_mode<synchronous>, transform_indices = @transform_3, window_bounds = array<i64: 32, 128>}, {pipeline_mode = #tpu.pipeline_mode<synchronous>, transform_indices = @transform_4, window_bounds = array<i64: 32, 128>}, {transform_indices = @transform_5, window_bounds = array<i64: 2, 2, 32>}, {transform_indices = @transform_6, window_bounds = array<i64: 2, 2, 32>}, {transform_indices = @transform_7, window_bounds = array<i64: 8, 2, 32>}]} {
    %c0 = arith.constant 0 : index
    %0 = memref.load %arg1[%c0] : memref<1xi32, #tpu.memory_space<smem>>
    %c0_0 = arith.constant 0 : index
    %c0_1 = arith.constant 0 : index
    %1 = vector.load %arg4[%c0_0, %c0_1] : memref<2x1xi32, #tpu.memory_space<vmem>>, vector<2x1xi32>
    %c0_2 = arith.constant 0 : index
    %c0_3 = arith.constant 0 : index
    %2 = vector.load %arg5[%c0_2, %c0_3] : memref<32x128xbf16, #tpu.memory_space<vmem>>, vector<32x128xbf16>
    %c0_4 = arith.constant 0 : index
    %c0_5 = arith.constant 0 : index
    %3 = vector.load %arg6[%c0_4, %c0_5] : memref<32x128xbf16, #tpu.memory_space<vmem>>, vector<32x128xbf16>
    %cst = arith.constant 0.000000e+00 : f32
    %4 = vector.broadcast %cst : f32 to vector<8x2x32xf32>
    %c0_6 = arith.constant 0 : index
    %c0_7 = arith.constant 0 : index
    %c0_8 = arith.constant 0 : index
    %5 = vector.load %arg9[%c0_6, %c0_7, %c0_8] : memref<8x2x32xf32, #tpu.memory_space<vmem>>, vector<8x2x32xf32>
    tpu.vector_store %arg9[%c0_6, %c0_7, %c0_8], %4 {strides = array<i32>} : memref<8x2x32xf32, #tpu.memory_space<vmem>>, vector<8x2x32xf32>,
    %cst_9 = arith.constant 0.000000e+00 : f32
    %6 = vector.broadcast %cst_9 : f32 to vector<8x2x32xf32>
    %c0_10 = arith.constant 0 : index
    %c0_11 = arith.constant 0 : index
    %c0_12 = arith.constant 0 : index
    %7 = vector.load %arg10[%c0_10, %c0_11, %c0_12] : memref<8x2x32xf32, #tpu.memory_space<vmem>>, vector<8x2x32xf32>
    tpu.vector_store %arg10[%c0_10, %c0_11, %c0_12], %6 {strides = array<i32>} : memref<8x2x32xf32, #tpu.memory_space<vmem>>, vector<8x2x32xf32>,
    %c0_13 = arith.constant 0 : index
    %c0_14 = arith.constant 0 : index
    %c0_15 = arith.constant 0 : index
    %8 = vector.load %arg7[%c0_13, %c0_14, %c0_15] : memref<2x2x32xf32, #tpu.memory_space<vmem>>, vector<1x2x32xf32>
    %9 = vector.shape_cast %8 : vector<1x2x32xf32> to vector<2x32xf32>
    %c0_16 = arith.constant 0 : index
    %c0_17 = arith.constant 0 : index
    %c0_18 = arith.constant 0 : index
    %10 = vector.load %arg8[%c0_16, %c0_17, %c0_18] : memref<2x2x32xf32, #tpu.memory_space<vmem>>, vector<1x2x32xf32>
    %11 = vector.shape_cast %10 : vector<1x2x32xf32> to vector<2x32xf32>
    %c1 = arith.constant 1 : index
    %c0_19 = arith.constant 0 : index
    %c0_20 = arith.constant 0 : index
    %12 = vector.load %arg7[%c1, %c0_19, %c0_20] : memref<2x2x32xf32, #tpu.memory_space<vmem>>, vector<1x2x32xf32>
    %13 = vector.shape_cast %12 : vector<1x2x32xf32> to vector<2x32xf32>
    %c1_21 = arith.constant 1 : index
    %c0_22 = arith.constant 0 : index
    %c0_23 = arith.constant 0 : index
    %14 = vector.load %arg8[%c1_21, %c0_22, %c0_23] : memref<2x2x32xf32, #tpu.memory_space<vmem>>, vector<1x2x32xf32>
    %15 = vector.shape_cast %14 : vector<1x2x32xf32> to vector<2x32xf32>
    %c0_i32 = arith.constant 0 : i32
    %16 = arith.subi %0, %c0_i32 : i32
    %17 = arith.addi %c0_i32, %16 : i32
    %c1_i32 = arith.constant 1 : i32
    %18:4 = scf.for %arg11 = %c0_i32 to %17 step %c1_i32 iter_args(%arg12 = %9, %arg13 = %11, %arg14 = %13, %arg15 = %15) -> (vector<2x32xf32>, vector<2x32xf32>, vector<2x32xf32>, vector<2x32xf32>)  : i32 {
      %c1_i32_33 = arith.constant 1 : i32
      %23 = arith.subi %0, %c1_i32_33 : i32
      %24 = arith.subi %23, %arg11 : i32
      %25 = arith.index_cast %arg11 : i32 to index
      %c0_34 = arith.constant 0 : index
      %c0_35 = arith.constant 0 : index
      %26 = vector.load %arg2[%25, %c0_34, %c0_35] : memref<8x2x128xf32, #tpu.memory_space<vmem>>, vector<1x2x128xf32>
      %27 = vector.shape_cast %26 : vector<1x2x128xf32> to vector<2x128xf32>
      %28 = arith.truncf %arg12 : vector<2x32xf32> to vector<2x32xbf16>
      %cst_36 = arith.constant dense<0.000000e+00> : vector<2x128xf32>
      %29 = tpu.matmul %28, %2, %cst_36 {dimension_numbers = #tpu.dot_dimension_numbers<[1], [0], [0], [1], [0, 0, 1, 1], [], []>} : vector<2x32xbf16>, vector<32x128xbf16>, vector<2x128xf32> -> vector<2x128xf32>
      %30 = arith.addf %27, %29 : vector<2x128xf32>
      %31 = vector.extract_strided_slice %30 {offsets = [0, 0], sizes = [2, 32], strides = [1, 1]} : vector<2x128xf32> to vector<2x32xf32>
      %32 = arith.negf %31 : vector<2x32xf32>
      %33 = math.exp %32 : vector<2x32xf32>
      %cst_37 = arith.constant 1.000000e+00 : f32
      %34 = vector.broadcast %cst_37 : f32 to vector<2x32xf32>
      %35 = arith.addf %34, %33 : vector<2x32xf32>
      %36 = arith.divf %34, %35 : vector<2x32xf32>
      %37 = vector.extract_strided_slice %30 {offsets = [0, 32], sizes = [2, 32], strides = [1, 1]} : vector<2x128xf32> to vector<2x32xf32>
      %38 = arith.negf %37 : vector<2x32xf32>
      %39 = math.exp %38 : vector<2x32xf32>
      %cst_38 = arith.constant 1.000000e+00 : f32
      %40 = vector.broadcast %cst_38 : f32 to vector<2x32xf32>
      %41 = arith.addf %40, %39 : vector<2x32xf32>
      %42 = arith.divf %40, %41 : vector<2x32xf32>
      %43 = vector.extract_strided_slice %30 {offsets = [0, 64], sizes = [2, 32], strides = [1, 1]} : vector<2x128xf32> to vector<2x32xf32>
      %44 = math.tanh %43 : vector<2x32xf32>
      %45 = vector.extract_strided_slice %30 {offsets = [0, 96], sizes = [2, 32], strides = [1, 1]} : vector<2x128xf32> to vector<2x32xf32>
      %46 = arith.negf %45 : vector<2x32xf32>
      %47 = math.exp %46 : vector<2x32xf32>
      %cst_39 = arith.constant 1.000000e+00 : f32
      %48 = vector.broadcast %cst_39 : f32 to vector<2x32xf32>
      %49 = arith.addf %48, %47 : vector<2x32xf32>
      %50 = arith.divf %48, %49 : vector<2x32xf32>
      %51 = arith.mulf %42, %arg13 : vector<2x32xf32>
      %52 = arith.mulf %36, %44 : vector<2x32xf32>
      %53 = arith.addf %51, %52 : vector<2x32xf32>
      %54 = math.tanh %53 : vector<2x32xf32>
      %55 = arith.mulf %50, %54 : vector<2x32xf32>
      %56 = vector.broadcast %arg11 : i32 to vector<2x1xi32>
      %57 = arith.cmpi sgt, %1, %56 : vector<2x1xi32>
      %58 = vector.shape_cast %57 : vector<2x1xi1> to vector<2x1xi1>
      %59 = vector.broadcast %58 : vector<2x1xi1> to vector<2x32xi1>
      %60 = arith.select %59, %55, %arg12 : vector<2x32xi1>, vector<2x32xf32>
      %61 = vector.shape_cast %57 : vector<2x1xi1> to vector<2x1xi1>
      %62 = vector.broadcast %61 : vector<2x1xi1> to vector<2x32xi1>
      %63 = arith.select %62, %53, %arg13 : vector<2x32xi1>, vector<2x32xf32>
      %cst_40 = arith.constant 0.000000e+00 : f32
      %64 = vector.shape_cast %57 : vector<2x1xi1> to vector<2x1xi1>
      %65 = vector.broadcast %64 : vector<2x1xi1> to vector<2x32xi1>
      %66 = vector.broadcast %cst_40 : f32 to vector<2x32xf32>
      %67 = arith.select %65, %55, %66 : vector<2x32xi1>, vector<2x32xf32>
      %68 = arith.index_cast %arg11 : i32 to index
      %c0_41 = arith.constant 0 : index
      %c0_42 = arith.constant 0 : index
      %69 = vector.load %arg9[%68, %c0_41, %c0_42] : memref<8x2x32xf32, #tpu.memory_space<vmem>>, vector<1x2x32xf32>
      %70 = vector.shape_cast %69 : vector<1x2x32xf32> to vector<2x32xf32>
      %71 = vector.shape_cast %67 : vector<2x32xf32> to vector<1x2x32xf32>
      tpu.vector_store %arg9[%68, %c0_41, %c0_42], %71 {strides = array<i32>} : memref<8x2x32xf32, #tpu.memory_space<vmem>>, vector<1x2x32xf32>,
      %72 = arith.index_cast %24 : i32 to index
      %c0_43 = arith.constant 0 : index
      %c0_44 = arith.constant 0 : index
      %73 = vector.load %arg3[%72, %c0_43, %c0_44] : memref<8x2x128xf32, #tpu.memory_space<vmem>>, vector<1x2x128xf32>
      %74 = vector.shape_cast %73 : vector<1x2x128xf32> to vector<2x128xf32>
      %75 = arith.truncf %arg14 : vector<2x32xf32> to vector<2x32xbf16>
      %cst_45 = arith.constant dense<0.000000e+00> : vector<2x128xf32>
      %76 = tpu.matmul %75, %3, %cst_45 {dimension_numbers = #tpu.dot_dimension_numbers<[1], [0], [0], [1], [0, 0, 1, 1], [], []>} : vector<2x32xbf16>, vector<32x128xbf16>, vector<2x128xf32> -> vector<2x128xf32>
      %77 = arith.addf %74, %76 : vector<2x128xf32>
      %78 = vector.extract_strided_slice %77 {offsets = [0, 0], sizes = [2, 32], strides = [1, 1]} : vector<2x128xf32> to vector<2x32xf32>
      %79 = arith.negf %78 : vector<2x32xf32>
      %80 = math.exp %79 : vector<2x32xf32>
      %cst_46 = arith.constant 1.000000e+00 : f32
      %81 = vector.broadcast %cst_46 : f32 to vector<2x32xf32>
      %82 = arith.addf %81, %80 : vector<2x32xf32>
      %83 = arith.divf %81, %82 : vector<2x32xf32>
      %84 = vector.extract_strided_slice %77 {offsets = [0, 32], sizes = [2, 32], strides = [1, 1]} : vector<2x128xf32> to vector<2x32xf32>
      %85 = arith.negf %84 : vector<2x32xf32>
      %86 = math.exp %85 : vector<2x32xf32>
      %cst_47 = arith.constant 1.000000e+00 : f32
      %87 = vector.broadcast %cst_47 : f32 to vector<2x32xf32>
      %88 = arith.addf %87, %86 : vector<2x32xf32>
      %89 = arith.divf %87, %88 : vector<2x32xf32>
      %90 = vector.extract_strided_slice %77 {offsets = [0, 64], sizes = [2, 32], strides = [1, 1]} : vector<2x128xf32> to vector<2x32xf32>
      %91 = math.tanh %90 : vector<2x32xf32>
      %92 = vector.extract_strided_slice %77 {offsets = [0, 96], sizes = [2, 32], strides = [1, 1]} : vector<2x128xf32> to vector<2x32xf32>
      %93 = arith.negf %92 : vector<2x32xf32>
      %94 = math.exp %93 : vector<2x32xf32>
      %cst_48 = arith.constant 1.000000e+00 : f32
      %95 = vector.broadcast %cst_48 : f32 to vector<2x32xf32>
      %96 = arith.addf %95, %94 : vector<2x32xf32>
      %97 = arith.divf %95, %96 : vector<2x32xf32>
      %98 = arith.mulf %89, %arg15 : vector<2x32xf32>
      %99 = arith.mulf %83, %91 : vector<2x32xf32>
      %100 = arith.addf %98, %99 : vector<2x32xf32>
      %101 = math.tanh %100 : vector<2x32xf32>
      %102 = arith.mulf %97, %101 : vector<2x32xf32>
      %103 = vector.broadcast %24 : i32 to vector<2x1xi32>
      %104 = arith.cmpi sgt, %1, %103 : vector<2x1xi32>
      %105 = vector.shape_cast %104 : vector<2x1xi1> to vector<2x1xi1>
      %106 = vector.broadcast %105 : vector<2x1xi1> to vector<2x32xi1>
      %107 = arith.select %106, %102, %arg14 : vector<2x32xi1>, vector<2x32xf32>
      %108 = vector.shape_cast %104 : vector<2x1xi1> to vector<2x1xi1>
      %109 = vector.broadcast %108 : vector<2x1xi1> to vector<2x32xi1>
      %110 = arith.select %109, %100, %arg15 : vector<2x32xi1>, vector<2x32xf32>
      %cst_49 = arith.constant 0.000000e+00 : f32
      %111 = vector.shape_cast %104 : vector<2x1xi1> to vector<2x1xi1>
      %112 = vector.broadcast %111 : vector<2x1xi1> to vector<2x32xi1>
      %113 = vector.broadcast %cst_49 : f32 to vector<2x32xf32>
      %114 = arith.select %112, %102, %113 : vector<2x32xi1>, vector<2x32xf32>
      %115 = arith.index_cast %24 : i32 to index
      %c0_50 = arith.constant 0 : index
      %c0_51 = arith.constant 0 : index
      %116 = vector.load %arg10[%115, %c0_50, %c0_51] : memref<8x2x32xf32, #tpu.memory_space<vmem>>, vector<1x2x32xf32>
      %117 = vector.shape_cast %116 : vector<1x2x32xf32> to vector<2x32xf32>
      %118 = vector.shape_cast %114 : vector<2x32xf32> to vector<1x2x32xf32>
      tpu.vector_store %arg10[%115, %c0_50, %c0_51], %118 {strides = array<i32>} : memref<8x2x32xf32, #tpu.memory_space<vmem>>, vector<1x2x32xf32>,
      scf.yield %60, %63, %107, %110 : vector<2x32xf32>, vector<2x32xf32>, vector<2x32xf32>, vector<2x32xf32>
    }
    %c0_24 = arith.constant 0 : index
    %c0_25 = arith.constant 0 : index
    %c0_26 = arith.constant 0 : index
    %19 = vector.load %arg9[%c0_24, %c0_25, %c0_26] : memref<8x2x32xf32, #tpu.memory_space<vmem>>, vector<8x2x32xf32>
    %c0_27 = arith.constant 0 : index
    %c0_28 = arith.constant 0 : index
    %c0_29 = arith.constant 0 : index
    %20 = vector.load %arg10[%c0_27, %c0_28, %c0_29] : memref<8x2x32xf32, #tpu.memory_space<vmem>>, vector<8x2x32xf32>
    %21 = arith.addf %19, %20 : vector<8x2x32xf32>
    %c0_30 = arith.constant 0 : index
    %c0_31 = arith.constant 0 : index
    %c0_32 = arith.constant 0 : index
    %22 = vector.load %arg9[%c0_30, %c0_31, %c0_32] : memref<8x2x32xf32, #tpu.memory_space<vmem>>, vector<8x2x32xf32>
    tpu.vector_store %arg9[%c0_30, %c0_31, %c0_32], %21 {strides = array<i32>} : memref<8x2x32xf32, #tpu.memory_space<vmem>>, vector<8x2x32xf32>,
    return
  }
  func.func @transform_0(%arg0: i32, %arg1: memref<1xi32, #tpu.memory_space<smem>>) -> (i32, i32, i32) {
    %c0_i32 = arith.constant 0 : i32
    %c0_i32_0 = arith.constant 0 : i32
    %c0_i32_1 = arith.constant 0 : i32
    return %c0_i32, %arg0, %c0_i32_0 : i32, i32, i32
  }
  func.func @transform_1(%arg0: i32, %arg1: memref<1xi32, #tpu.memory_space<smem>>) -> (i32, i32, i32) {
    %c0_i32 = arith.constant 0 : i32
    %c0_i32_0 = arith.constant 0 : i32
    %c0_i32_1 = arith.constant 0 : i32
    return %c0_i32, %arg0, %c0_i32_0 : i32, i32, i32
  }
  func.func @transform_2(%arg0: i32, %arg1: memref<1xi32, #tpu.memory_space<smem>>) -> (i32, i32) {
    %c0_i32 = arith.constant 0 : i32
    %c0_i32_0 = arith.constant 0 : i32
    return %arg0, %c0_i32 : i32, i32
  }
  func.func @transform_3(%arg0: i32, %arg1: memref<1xi32, #tpu.memory_space<smem>>) -> (i32, i32) {
    %c0_i32 = arith.constant 0 : i32
    %c0_i32_0 = arith.constant 0 : i32
    %c0_i32_1 = arith.constant 0 : i32
    return %c0_i32, %c0_i32_0 : i32, i32
  }
  func.func @transform_4(%arg0: i32, %arg1: memref<1xi32, #tpu.memory_space<smem>>) -> (i32, i32) {
    %c0_i32 = arith.constant 0 : i32
    %c0_i32_0 = arith.constant 0 : i32
    %c0_i32_1 = arith.constant 0 : i32
    return %c0_i32, %c0_i32_0 : i32, i32
  }
  func.func @transform_5(%arg0: i32, %arg1: memref<1xi32, #tpu.memory_space<smem>>) -> (i32, i32, i32) {
    %c0_i32 = arith.constant 0 : i32
    %c0_i32_0 = arith.constant 0 : i32
    %c0_i32_1 = arith.constant 0 : i32
    return %c0_i32, %arg0, %c0_i32_0 : i32, i32, i32
  }
  func.func @transform_6(%arg0: i32, %arg1: memref<1xi32, #tpu.memory_space<smem>>) -> (i32, i32, i32) {
    %c0_i32 = arith.constant 0 : i32
    %c0_i32_0 = arith.constant 0 : i32
    %c0_i32_1 = arith.constant 0 : i32
    return %c0_i32, %arg0, %c0_i32_0 : i32, i32, i32
  }
  func.func @transform_7(%arg0: i32, %arg1: memref<1xi32, #tpu.memory_space<smem>>) -> (i32, i32, i32) {
    %c0_i32 = arith.constant 0 : i32
    %c0_i32_0 = arith.constant 0 : i32
    %c0_i32_1 = arith.constant 0 : i32
    return %c0_i32, %arg0, %c0_i32_0 : i32, i32, i32
  }
}

</mosaic_0001>

<bundles_post_ra>
// kernel: bilstm_layer_forward.2
= control target key start
LH: loop header
LB: loop body
LE: loop exit
PB: predicated region body
PF: predicated region fallthrough
CT: control target
= control target key end

     0   :  { %vm39_vm0 = vcmask 254976   ;;  %v509_v3 = vmov 0.0   ;;  %s809_s0 = inlined_call_operand.<no memory space> [shape: s32[1], index: 0, kind: input, shape index: {}]   ;;  %s810_s1 = inlined_call_operand.vmem [shape: f32[8,2,128], index: 1, kind: input, shape index: {}]   ;;  %s811_s2 = inlined_call_operand.vmem [shape: f32[8,2,128], index: 2, kind: input, shape index: {}]   ;;  %s812_s3 = inlined_call_operand.vmem [shape: s32[2,1], index: 3, kind: input, shape index: {}]   ;;  %s813_s4 = inlined_call_operand.vmem [shape: bf16[32,128], index: 4, kind: input, shape index: {}]   ;;  %s814_s5 = inlined_call_operand.vmem [shape: bf16[32,128], index: 5, kind: input, shape index: {}]   ;;  %s815_s8 = inlined_call_operand.vmem [shape: f32[8,2,32], index: 8, kind: output, shape index: {}]   ;;  %s816_s6 = inlined_call_operand.vmem [shape: f32[2,2,32], index: 6, kind: input, shape index: {}]   ;;  %s817_s7 = inlined_call_operand.vmem [shape: f32[2,2,32], index: 7, kind: input, shape index: {}]  }
   0x1   :  { %v564_v0 = vld [vmem:[%s812_s3] sm:$0x3]  ;;  %v574_v2 = vld [vmem:[%s813_s4 + $0x4] sm:$0xf]  ;;  %40 = vst.msk [vmem:[%s815_s8] sm:$0x3] %vm39_vm0, %v509_v3 }
   0x2   :  { %v569_v1 = vld [vmem:[%s813_s4] sm:$0xf]  ;;  %41 = vst.msk [vmem:[%s815_s8 + $0x2] sm:$0x3] %vm39_vm0, %v509_v3  ;;  %42 = vst.msk [vmem:[%s815_s8 + $0x4] sm:$0x3] %vm39_vm0, %v509_v3 }
   0x3   :  { %43 = vst.msk [vmem:[%s815_s8 + $0x6] sm:$0x3] %vm39_vm0, %v509_v3  ;;  %44 = vst.msk [vmem:[%s815_s8 + $0x8] sm:$0x3] %vm39_vm0, %v509_v3  ;;  %v619_v4 = vld [vmem:[%s813_s4 + $0x8] sm:$0xf] }
   0x4   :  { %45 = vst.msk [vmem:[%s815_s8 + $0xa] sm:$0x3] %vm39_vm0, %v509_v3  ;;  %46 = vst.msk [vmem:[%s815_s8 + $0xc] sm:$0x3] %vm39_vm0, %v509_v3  ;;  %v624_v5 = vld [vmem:[%s813_s4 + $0xc] sm:$0xf] }
   0x5   :  { %47 = vst.msk [vmem:[%s815_s8 + $0xe] sm:$0x3] %vm39_vm0, %v509_v3  ;;  %48 = vst.msk [vmem:[#allocation2] sm:$0x3] %vm39_vm0, %v509_v3  ;;  %v629_v6 = vld [vmem:[%s814_s5] sm:$0xf] }
   0x6   :  { %49 = vst.msk [vmem:[#allocation2 + $0x2] sm:$0x3] %vm39_vm0, %v509_v3  ;;  %50 = vst.msk [vmem:[#allocation2 + $0x4] sm:$0x3] %vm39_vm0, %v509_v3  ;;  %v634_v7 = vld [vmem:[%s814_s5 + $0x4] sm:$0xf] }
   0x7   :  { %51 = vst.msk [vmem:[#allocation2 + $0x6] sm:$0x3] %vm39_vm0, %v509_v3  ;;  %52 = vst.msk [vmem:[#allocation2 + $0x8] sm:$0x3] %vm39_vm0, %v509_v3  ;;  %v639_v8 = vld [vmem:[%s814_s5 + $0x8] sm:$0xf] }
   0x8   :  { %53 = vst.msk [vmem:[#allocation2 + $0xa] sm:$0x3] %vm39_vm0, %v509_v3  ;;  %54 = vst.msk [vmem:[#allocation2 + $0xc] sm:$0x3] %vm39_vm0, %v509_v3  ;;  %v644_v9 = vld [vmem:[%s814_s5 + $0xc] sm:$0xf] }
   0x9   :  { %55 = vst.msk [vmem:[#allocation2 + $0xe] sm:$0x3] %vm39_vm0, %v509_v3  ;;  %v56_v10 = vld [vmem:[%s816_s6] sm:$0x3]   ;;  %v368_v12 = vld [vmem:[%s816_s6 + $0x2] sm:$0x3]  }
   0xa   :  { %v57_v11 = vld [vmem:[%s817_s7] sm:$0x3]   ;;  %v369_v13 = vld [vmem:[%s817_s7 + $0x2] sm:$0x3]   ;;  %p370_p0 = scmp.le.s32.totalorder %s809_s0, 0 }
   0xb   :  { %s669_s5 = smov (!%p370_p0), 0  }
   0xc   :  { %357 = sbr.rel (%p370_p0) target bundleno = 739 (0x2e3), region = 55 }
  0x13 LB: > { %v373_v14 = vcombine.low %v569_v1, %v574_v2  ;;  %v378_v15 = vcombine.low %v629_v6, %v634_v7  ;;  %v510_v16 = vmov 0.0   ;;  %v374_v17 = vcombine.low %v619_v4, %v624_v5  ;;  %s512_s6 = smov 32   ;;  %s371_s25 = sadd.s32 4294967295, %s809_s0  ;;  %s507_s5 = sphi %s669_s5, %s65_s5   ;;  %v503_v10 = vphi %v56_v10, %v293_v10   ;;  %v499_v11 = vphi %v57_v11, %v297_v11   ;;  %v495_v12 = vphi %v368_v12, %v301_v12   ;;  %v491_v13 = vphi %v369_v13, %v305_v13  }
  0x14   : > { %388 = vmatprep.subr.bf16.mxu0 %v510_v16  ;;  %396 = vmatprep.subr.bf16.mxu1 %v510_v16  ;;  %v379_v18 = vcombine.low %v639_v8, %v644_v9  ;;  %vm511_vm1 = vmmov 0   ;;  %v77_v19 = vpack.c.bf16 %v503_v10, %v503_v10  ;;  %v186_v20 = vpack.c.bf16 %v495_v12, %v495_v12  ;;  %s700_s26 = ssub.s32 %s371_s25, %s507_s5  ;;  %s372_s27 = sshll.u32 %s507_s5, 1 }
  0x15   : > { %389 = vmatpush3.bf16.msra.mxu0 %v373_v14  ;;  %397 = vmatpush3.bf16.msra.mxu1 %v378_v15  ;;  %vm90_vm2 = vcmask 261120   ;;  %s377_s28 = sshll.u32 %s700_s26, 1  ;;  %s75_s9 = scalar_lea.vmem %s810_s1, %s372_s27  ;;  %v513_v33 = vmov 0   ;;  %v163_v42 = vstv %s507_s5  ;;  %v271_v46 = vstv %s700_s26 }
  0x16   : > { %390 = vmatprep.subr.bf16.mxu0 %v510_v16  ;;  %398 = vmatprep.subr.bf16.mxu1 %v510_v16  ;;  %s184_s12 = scalar_lea.vmem %s811_s2, %s377_s28  ;;  %v76_v21 = vld [vmem:[%s75_s9] sm:$0x3]  ;;  %s514_s13 = smov 64   ;;  %vm164_vm3 = vcmp.gt.s32.totalorder %v564_v0, %v163_v42  ;;  %vm272_vm4 = vcmp.gt.s32.totalorder %v564_v0, %v271_v46 }
  0x17   : > { %392 = vmatprep.mubr.msk.bf16.mxu0 %vm511_vm1, %v510_v16  ;;  %400 = vmatprep.mubr.msk.bf16.mxu1 %vm511_vm1, %v510_v16  ;;  %v185_v22 = vld [vmem:[%s184_s12] sm:$0x3]  ;;  %v165_v49 = vsel %vm164_vm3, 1, %v513_v33  ;;  %v273_v51 = vsel %vm272_vm4, 1, %v513_v33  ;;  %s515_s3 = smov 96   ;;  %s181_s15 = scalar_lea.vmem %s815_s8, %s372_s27 }
  0x18   : > { %143 = vrot.lane.b32.xlu1 %v499_v11, %s512_s6  ;;  %451 = vset.pattern.permute.xlu0 %v513_v33  ;;  %s289_s16 = scalar_lea.vmem [#allocation2], %s377_s28  ;;  %s65_s5 = sadd.s32 1, %s507_s5  }
  0x19   : > { %391 = vmatpush3.bf16.msra.mxu0 %v374_v17  ;;  %399 = vmatpush3.bf16.msra.mxu1 %v379_v18  ;;  %p64_p1 = scmp.ge.s32.totalorder %s65_s5, %s809_s0 }
  0x1a   : > { %452 = vset.pattern.permute.xlu1 %v513_v33 }
  0x1c   : > { %393 = vmatmul.mubr.msk.bf16.vlgmr.msra.gmra.mrb[0].mxu0 %vm90_vm2, %v77_v19  ;;  %401 = vmatmul.mubr.msk.bf16.vlgmr.msra.gmra.mrb[0].mxu1 %vm90_vm2, %v186_v20 }
  0x1d   : > { %251 = vrot.lane.b32.xlu1 %v491_v13, %s512_s6 }
  0x8a   : > { %v144_v52 = vpop.permute.xlu1 %143 }
  0x8f   : > { %v252_v54 = vpop.permute.xlu1 %251 }
  0xef   : > { %v128_v23 = vpop.f32.mrb[0].mxu0  ;;  %v236_v24 = vpop.f32.mrb[0].mxu1 }
  0xf0   : > { %v134_v25 = vadd.f32 %v128_v23, %v76_v21  ;;  %v394_v26 = vpop.f32.mrb[1].mxu0  ;;  %v242_v27 = vadd.f32 %v236_v24, %v185_v22  ;;  %v402_v28 = vpop.f32.mrb[1].mxu1 }
  0xf1   : > { %v131_v29 = vpop.f32.mrb[2].mxu0  ;;  %v239_v30 = vpop.f32.mrb[2].mxu1 }
  0xf2   : > { %453 = vtanh.f32 %v134_v25  ;;  %v395_v31 = vpop.f32.mrb[3].mxu0  ;;  %v403_v32 = vpop.f32.mrb[3].mxu1  ;;  %v376_v36 = vmul.f32 -1.442695, %v134_v25  ;;  %v381_v37 = vmul.f32 -1.442695, %v242_v27 }
  0xf3   : > { %455 = vtanh.f32 %v242_v27 }
  0xf4   : > { %457 = vpow2.f32 %v376_v36 }
  0xf5   : > { %459 = vpow2.f32 %v381_v37 }
  0xfc   : > { %v454_v34 = vpop.eup %453 }
  0xfd   : > { %148 = vrot.lane.b32.xlu0 %v454_v34, %s514_s13  ;;  %v456_v35 = vpop.eup %455 }
  0xfe   : > { %v458_v38 = vpop.eup %457 }
  0xff   : > { %v138_v39 = vadd.f32 1.0, %v458_v38  ;;  %v460_v40 = vpop.eup %459 }
 0x100   : > { %v246_v41 = vadd.f32 1.0, %v460_v40 }
 0x101   : > { %256 = vrot.lane.b32.xlu0 %v456_v35, %s514_s13  ;;  %461 = vrcp.f32 %v138_v39 }
 0x102   : > { %463 = vrcp.f32 %v246_v41 }
 0x10b   : > { %v462_v43 = vpop.eup %461 }
 0x10c   : > { %v464_v47 = vpop.eup %463  ;;  %v146_v53 = vmul.f32 %v462_v43, %v144_v52 }
 0x10d   : > { %v254_v57 = vmul.f32 %v464_v47, %v252_v54 }
 0x16f   : > { %v149_v44 = vpop.permute.xlu0 %148 }
 0x170   : > { %v151_v45 = vmul.f32 %v462_v43, %v149_v44 }
 0x172   : > { %153 = vrot.lane.b32.xlu0 %v151_v45, %s512_s6 }
 0x173   : > { %v257_v48 = vpop.permute.xlu0 %256 }
 0x174   : > { %v259_v50 = vmul.f32 %v464_v47, %v257_v48 }
 0x176   : > { %167 = vperm.xlu0 %451, %v165_v49   ;;  %261 = vrot.lane.b32.xlu1 %v259_v50, %s512_s6 }
 0x17a   : > { %275 = vperm.xlu1 %452, %v273_v51  }
 0x1e4   : > { %v154_v55 = vpop.permute.xlu0 %153 }
 0x1e5   : > { %v156_v56 = vadd.f32 %v154_v55, %v146_v53 }
 0x1e7   : > { %465 = vtanh.f32 %v156_v56 }
 0x1e8   : > { %v262_v58 = vpop.permute.xlu1 %261 }
 0x1e9   : > { %v264_v59 = vadd.f32 %v262_v58, %v254_v57 }
 0x1eb   : > { %467 = vtanh.f32 %v264_v59 }
 0x1f1   : > { %v466_v60 = vpop.eup %465 }
 0x1f2   : > { %159 = vrot.lane.b32.xlu1 %v466_v60, %s514_s13 }
 0x1f5   : > { %v468_v61 = vpop.eup %467  ;;  %v168_v62 = vpop.permute.xlu0 %167 }
 0x1f6   : > { %171 = vrot.lane.b32.xlu1 %v503_v10, %s515_s3  ;;  %267 = vrot.lane.b32.xlu0 %v468_v61, %s514_s13  ;;  %vm169_vm5 = vcmp.eq.s32.totalorder %v168_v62, 1 }
 0x1f7   : > { %v175_v63 = vsel %vm169_vm5, %v156_v56, %v144_v52 }
 0x1f9   : > { %v276_v3 = vpop.permute.xlu1 %275 }
 0x1fa   : > { %279 = vrot.lane.b32.xlu0 %v495_v12, %s515_s3  ;;  %vm277_vm6 = vcmp.eq.s32.totalorder %v276_v3, 1 }
 0x1fb   : > { %v283_v12 = vsel %vm277_vm6, %v264_v59, %v252_v54 }
 0x1fe   : > { %296 = vrot.lane.b32.xlu0 %v175_v63, %s515_s3 }
 0x264   : > { %v160_v11 = vpop.permute.xlu1 %159 }
 0x265   : > { %v162_v13 = vmul.f32 %v462_v43, %v160_v11 }
 0x267   : > { %v176_v14 = vsel %vm169_vm5, %v162_v13, 0.0 }
 0x268   : > { %v268_v15 = vpop.permute.xlu0 %267  ;;  %178 = vrot.lane.b32.xlu1 %v176_v14, %s512_s6  ;;  %v172_v16 = vpop.permute.xlu1 %171 }
 0x269   : > { %v270_v17 = vmul.f32 %v464_v47, %v268_v15  ;;  %v174_v18 = vsel %vm169_vm5, %v162_v13, %v172_v16 }
 0x26b   : > { %v284_v10 = vsel %vm277_vm6, %v270_v17, 0.0 }
 0x26c   : > { %v280_v19 = vpop.permute.xlu0 %279  ;;  %286 = vrot.lane.b32.xlu0 %v284_v10, %s512_s6  ;;  %292 = vrot.lane.b32.xlu1 %v174_v18, %s512_s6 }
 0x26d   : > { %v282_v20 = vsel %vm277_vm6, %v270_v17, %v280_v19 }
 0x270   : > { %v297_v11 = vpop.permute.xlu0 %296   ;;  %304 = vrot.lane.b32.xlu0 %v283_v12, %s515_s3  ;;  %300 = vrot.lane.b32.xlu1 %v282_v20, %s512_s6 }
 0x2da   : > { %v179_v21 = vpop.permute.xlu1 %178 }
 0x2db   : > { %182 = vst.msk [vmem:[%s181_s15] sm:$0x3] %vm39_vm0, %v179_v21 }
 0x2dc   :  { %67 = sbr.rel (!%p64_p1) target bundleno = 19 (0x13), region = 61 }
 0x2de   : > { %v287_v22 = vpop.permute.xlu0 %286  ;;  %v293_v10 = vpop.permute.xlu1 %292  }
 0x2df   : > { %290 = vst.msk [vmem:[%s289_s16] sm:$0x3] %vm39_vm0, %v287_v22 }
 0x2e2   : > { %v305_v13 = vpop.permute.xlu0 %304   ;;  %v301_v12 = vpop.permute.xlu1 %300  }
 0x2e3 PF:  { %v307_v23 = vld [vmem:[%s815_s8] sm:$0x3]  ;;  %v308_v25 = vld [vmem:[%s815_s8 + $0x2] sm:$0x3]  ;;  %v309_v28 = vld [vmem:[%s815_s8 + $0x4] sm:$0x3] }
 0x2e4   :  { %v310_v0 = vld [vmem:[%s815_s8 + $0x6] sm:$0x3]  ;;  %v311_v2 = vld [vmem:[%s815_s8 + $0x8] sm:$0x3]  ;;  %v312_v6 = vld [vmem:[%s815_s8 + $0xa] sm:$0x3] }
 0x2e5   :  { %v313_v32 = vld [vmem:[%s815_s8 + $0xc] sm:$0x3]  ;;  %v314_v34 = vld [vmem:[%s815_s8 + $0xe] sm:$0x3] }
 0x2e6   :  { %v315_v24 = vld [vmem:[#allocation2] sm:$0x3]  ;;  %v316_v27 = vld [vmem:[#allocation2 + $0x2] sm:$0x3]  ;;  %v317_v29 = vld [vmem:[#allocation2 + $0x4] sm:$0x3] }
 0x2e7   :  { %v323_v26 = vadd.f32 %v315_v24, %v307_v23  ;;  %v324_v30 = vadd.f32 %v316_v27, %v308_v25  ;;  %v325_v31 = vadd.f32 %v317_v29, %v309_v28  ;;  %v318_v1 = vld [vmem:[#allocation2 + $0x6] sm:$0x3]  ;;  %v319_v5 = vld [vmem:[#allocation2 + $0x8] sm:$0x3]  ;;  %v320_v7 = vld [vmem:[#allocation2 + $0xa] sm:$0x3] }
 0x2e8   :  { %v326_v4 = vadd.f32 %v318_v1, %v310_v0  ;;  %v327_v8 = vadd.f32 %v319_v5, %v311_v2  ;;  %v328_v9 = vadd.f32 %v320_v7, %v312_v6  ;;  %v321_v33 = vld [vmem:[#allocation2 + $0xc] sm:$0x3]  ;;  %v322_v36 = vld [vmem:[#allocation2 + $0xe] sm:$0x3] }
 0x2e9   :  { %331 = vst.msk [vmem:[%s815_s8] sm:$0x3] %vm39_vm0, %v323_v26  ;;  %332 = vst.msk [vmem:[%s815_s8 + $0x2] sm:$0x3] %vm39_vm0, %v324_v30  ;;  %v329_v35 = vadd.f32 %v321_v33, %v313_v32  ;;  %v330_v37 = vadd.f32 %v322_v36, %v314_v34 }
 0x2ea   :  { %333 = vst.msk [vmem:[%s815_s8 + $0x4] sm:$0x3] %vm39_vm0, %v325_v31  ;;  %334 = vst.msk [vmem:[%s815_s8 + $0x6] sm:$0x3] %vm39_vm0, %v326_v4 }
 0x2eb   :  { %335 = vst.msk [vmem:[%s815_s8 + $0x8] sm:$0x3] %vm39_vm0, %v327_v8  ;;  %336 = vst.msk [vmem:[%s815_s8 + $0xa] sm:$0x3] %vm39_vm0, %v328_v9 }
 0x2ec   :  { %337 = vst.msk [vmem:[%s815_s8 + $0xc] sm:$0x3] %vm39_vm0, %v329_v35  ;;  %338 = vst.msk [vmem:[%s815_s8 + $0xe] sm:$0x3] %vm39_vm0, %v330_v37 }

</bundles_post_ra>
